<compile_context>
chip_gen: v7x
topology: tpu7x:2x2x1
jax: 0.10.0
libtpu: 0.0.40
codegen_flags: <defaults>
</compile_context>

<pallas_src>
import functools

import jax
import jax.numpy as jnp
from jax.experimental import pallas as pl
from jax.experimental.pallas import tpu as pltpu


def _round_up(a, m):
    return ((a + m - 1) // m) * m


def _net_kernel(x_ref, wp_ref, bp_ref, wfc_ref, bfc_ref, o_ref, *, reduce_axis):
    """One batch tile of Net.forward.

    x_ref  : (TILE_B, C, HW) or (TILE_B, HW, C) — lane-dense flattened input
    wp_ref : (C, FEAT)    stand-in backbone projection, (in, out), 1/HW folded in
    bp_ref : (1, FEAT)
    wfc_ref: (FEAT, NC_PAD)  fc weight, (in, out), zero-padded class dim
    bfc_ref: (1, NC_PAD)
    o_ref  : (TILE_B, NC_PAD)
    """
    x = x_ref[...].astype(jnp.float32)

    # global average pool: vector reduce; the 1/HW scale lives in wp already
    gap = jnp.sum(x, axis=reduce_axis)                               # (TILE_B, C)

    # stand-in backbone head: Linear(C, 512) + ReLU (MXU, f32 accumulate)
    feats = jnp.dot(gap.astype(wp_ref.dtype), wp_ref[...],
                    preferred_element_type=jnp.float32)
    feats = jnp.maximum(feats + bp_ref[...].astype(jnp.float32), 0.0)

    # fc: nn.Linear(512, num_class) on the 128-padded class dim (full-width store)
    out = jnp.dot(feats.astype(wfc_ref.dtype), wfc_ref[...],
                  preferred_element_type=jnp.float32)
    o_ref[...] = (out + bfc_ref[...].astype(jnp.float32)).astype(o_ref.dtype)


def net_forward(x, w_proj, b_proj, w_fc, b_fc, *, tile_b=None,
                compute_dtype=jnp.float32):
    """Forward pass of Net.

    x      : (B, C, H, W)       NCHW float32
    w_proj : (FEAT, C)          PyTorch-layout (out, in) stand-in projection
    b_proj : (FEAT,)
    w_fc   : (NUM_CLASS, FEAT)  PyTorch-layout fc weight
    b_fc   : (NUM_CLASS,)
    returns (B, NUM_CLASS) float32
    """
    B, C, H, W = x.shape
    feat = w_proj.shape[0]
    nc = w_fc.shape[0]
    hw = H * W
    x_item = jnp.dtype(compute_dtype).itemsize

    nc_pad = _round_up(max(nc, 128), 128)            # lane-dense class dim

    # ---- generation-aware tile / VMEM budget -------------------------------
    try:
        vmem_cap = int(pltpu.get_tpu_info().vmem_capacity_bytes)
    except Exception:
        vmem_cap = 64 * 1024 * 1024
    if vmem_cap <= 64 * 1024 * 1024:                 # v7x: 64 MiB physical VMEM
        default_tile, vmem_budget = 128, 48 * 1024 * 1024
    else:                                            # v5e / v6e: 128 MiB
        default_tile, vmem_budget = 256, 100 * 1024 * 1024

    if tile_b is None:
        tile_b = default_tile
    b_pad8 = _round_up(B, 8)
    tile_b = max(8, min(_round_up(tile_b, 8), b_pad8))
    # >= 2 grid steps when the batch allows: megacore split + DMA/compute overlap
    if b_pad8 >= 16 and tile_b > b_pad8 // 2:
        tile_b = max(8, ((b_pad8 // 2) // 8) * 8)

    def tile_bytes(tb):
        return (2 * tb * C * hw * x_item             # double-buffered x tile
                + 2 * tb * nc_pad * 4                # double-buffered out tile
                + (C * feat + feat * nc_pad) * x_item  # single-buffered weights
                + (feat + nc_pad) * 4)               # biases (f32)

    while tile_b > 8 and tile_bytes(tile_b) > vmem_budget:
        tile_b = max(8, ((tile_b // 2) // 8) * 8)

    b_pad = _round_up(B, tile_b)
    grid = (b_pad // tile_b,)

    # ---- host-side layout plumbing (jitted, free relative to the kernel) ---
    channels_last = (C % 128 == 0)                   # real backbone: C=512, HW=49
    if channels_last:
        x3 = jnp.transpose(x.reshape(B, C, hw), (0, 2, 1)).astype(compute_dtype)
        reduce_axis, blk_x = 1, (tile_b, hw, C)      # (B, HW, C): C lane-dense
    else:
        x3 = x.reshape(B, C, hw).astype(compute_dtype)
        reduce_axis, blk_x = 2, (tile_b, C, hw)      # (B, C, HW): HW lane-dense
    if b_pad != B:
        x3 = jnp.pad(x3, ((0, b_pad - B), (0, 0), (0, 0)))

    # fold the 1/HW GAP scale into the projection weight
    wp = (w_proj.T.astype(jnp.float32) * jnp.float32(1.0 / hw)).astype(compute_dtype)
    bp = b_proj.reshape(1, feat).astype(jnp.float32)
    wfc = jnp.pad(w_fc.T.astype(compute_dtype), ((0, 0), (0, nc_pad - nc)))
    bfc = jnp.pad(b_fc.reshape(1, nc).astype(jnp.float32),
                  ((0, 0), (0, nc_pad - nc)))

    # single-buffer the block-index-invariant (resident) weight specs
    const_kw = {}
    if hasattr(pl, "Buffered"):
        try:
            const_kw = dict(pipeline_mode=pl.Buffered(1))
        except Exception:
            const_kw = {}

    def const_spec(shape):
        return pl.BlockSpec(shape, lambda i: (0, 0), **const_kw)

    cost = pl.CostEstimate(
        flops=2 * b_pad * (C * feat + feat * nc_pad) + b_pad * C * hw,
        transcendentals=0,
        bytes_accessed=(b_pad * C * hw * x_item + b_pad * nc_pad * 4
                        + (C * feat + feat * nc_pad) * x_item
                        + (feat + nc_pad) * 4),
    )
    vmem_limit = int(min(vmem_budget,
                         max(8 * 1024 * 1024, int(1.5 * tile_bytes(tile_b)))))

    kernel = functools.partial(_net_kernel, reduce_axis=reduce_axis)

    out = pl.pallas_call(
        kernel,
        out_shape=jax.ShapeDtypeStruct((b_pad, nc_pad), jnp.float32),
        grid_spec=pltpu.PrefetchScalarGridSpec(
            num_scalar_prefetch=0,
            grid=grid,
            in_specs=[
                pl.BlockSpec(blk_x, lambda i: (i, 0, 0)),   # batch tiles of x
                const_spec((C, feat)),                      # resident weights
                const_spec((1, feat)),
                const_spec((feat, nc_pad)),
                const_spec((1, nc_pad)),
            ],
            out_specs=pl.BlockSpec((tile_b, nc_pad), lambda i: (i, 0)),
        ),
        compiler_params=pltpu.CompilerParams(
            dimension_semantics=("parallel",),   # batch axis shards across TCs
            vmem_limit_bytes=vmem_limit,
        ),
        cost_estimate=cost,
    )(x3, wp, bp, wfc, bfc)

    return out[:B, :nc]


def reference_forward(x, w_proj, b_proj, w_fc, b_fc):
    gap = jnp.mean(x, axis=(2, 3))
    feats = jnp.maximum(gap @ w_proj.T + b_proj, 0.0)
    return feats @ w_fc.T + b_fc


if __name__ == "__main__":
    B, C, H, W = 2, 4, 16, 16
    FEAT = 512
    NUM_CLASS = 10

    key = jax.random.PRNGKey(0)
    kx, k1, k2, k3, k4 = jax.random.split(key, 5)
    x = jax.random.normal(kx, (B, C, H, W), jnp.float32)   # NCHW

    # PyTorch-layout parameters: weight (out, in), bias (out,)
    w_proj = jax.random.uniform(k1, (FEAT, C), jnp.float32,
                                minval=-0.1, maxval=0.1)
    b_proj = jax.random.uniform(k2, (FEAT,), jnp.float32,
                                minval=-0.1, maxval=0.1)
    bound = (1.0 / FEAT) ** 0.5
    w_fc = jax.random.uniform(k3, (NUM_CLASS, FEAT), jnp.float32,
                              minval=-bound, maxval=bound)
    b_fc = jax.random.uniform(k4, (NUM_CLASS,), jnp.float32,
                              minval=-bound, maxval=bound)

    # jit the wrapper so the layout plumbing fuses with / folds around the kernel
    fwd = jax.jit(net_forward)
    out = jax.block_until_ready(fwd(x, w_proj, b_proj, w_fc, b_fc))

    ref = reference_forward(x, w_proj, b_proj, w_fc, b_fc)
    assert out.shape == (B, NUM_CLASS), out.shape
    assert jnp.allclose(out, ref, atol=1e-4, rtol=1e-4), "mismatch vs reference"

    print("KERNEL_OK")
</pallas_src>

<mosaic_0001>
module attributes {stable_mosaic.version = 11 : i64} {
  func.func @_net_kernel(%arg0: i32, %arg1: memref<8x4x256xf32, #tpu.memory_space<vmem>>, %arg2: memref<4x512xf32, #tpu.memory_space<vmem>>, %arg3: memref<1x512xf32, #tpu.memory_space<vmem>>, %arg4: memref<512x128xf32, #tpu.memory_space<vmem>>, %arg5: memref<1x128xf32, #tpu.memory_space<vmem>>, %arg6: memref<8x128xf32, #tpu.memory_space<vmem>>) attributes {dimension_semantics = [#tpu.dimension_semantics<parallel>], iteration_bounds = array<i64: 1>, scalar_prefetch = 0 : i64, scratch_operands = 0 : i64, tpu.core_type = #tpu.core_type<tc>, window_params = [{transform_indices = @transform_0, window_bounds = array<i64: 8, 4, 256>}, {pipeline_mode = #tpu.pipeline_mode<synchronous>, transform_indices = @transform_1, window_bounds = array<i64: 4, 512>}, {pipeline_mode = #tpu.pipeline_mode<synchronous>, transform_indices = @transform_2, window_bounds = array<i64: 1, 512>}, {pipeline_mode = #tpu.pipeline_mode<synchronous>, transform_indices = @transform_3, window_bounds = array<i64: 512, 128>}, {pipeline_mode = #tpu.pipeline_mode<synchronous>, transform_indices = @transform_4, window_bounds = array<i64: 1, 128>}, {transform_indices = @transform_5, window_bounds = array<i64: 8, 128>}]} {
    %c0 = arith.constant 0 : index
    %c0_0 = arith.constant 0 : index
    %c0_1 = arith.constant 0 : index
    %0 = vector.load %arg1[%c0, %c0_0, %c0_1] : memref<8x4x256xf32, #tpu.memory_space<vmem>>, vector<8x4x256xf32>
    %cst = arith.constant dense<0.000000e+00> : vector<8x4xf32>
    %1 = vector.multi_reduction <add>, %0, %cst [2] : vector<8x4x256xf32> to vector<8x4xf32>
    %c0_2 = arith.constant 0 : index
    %c0_3 = arith.constant 0 : index
    %2 = vector.load %arg2[%c0_2, %c0_3] : memref<4x512xf32, #tpu.memory_space<vmem>>, vector<4x512xf32>
    %cst_4 = arith.constant dense<0.000000e+00> : vector<8x512xf32>
    %3 = tpu.matmul %1, %2, %cst_4 {dimension_numbers = #tpu.dot_dimension_numbers<[1], [0], [0], [1], [0, 0, 1, 1], [], []>} : vector<8x4xf32>, vector<4x512xf32>, vector<8x512xf32> -> vector<8x512xf32>
    %c0_5 = arith.constant 0 : index
    %c0_6 = arith.constant 0 : index
    %4 = vector.load %arg3[%c0_5, %c0_6] : memref<1x512xf32, #tpu.memory_space<vmem>>, vector<1x512xf32>
    %5 = vector.broadcast %4 : vector<1x512xf32> to vector<8x512xf32>
    %6 = arith.addf %3, %5 : vector<8x512xf32>
    %cst_7 = arith.constant 0.000000e+00 : f32
    %7 = vector.broadcast %cst_7 : f32 to vector<8x512xf32>
    %8 = arith.maximumf %6, %7 : vector<8x512xf32>
    %c0_8 = arith.constant 0 : index
    %c0_9 = arith.constant 0 : index
    %9 = vector.load %arg4[%c0_8, %c0_9] : memref<512x128xf32, #tpu.memory_space<vmem>>, vector<512x128xf32>
    %cst_10 = arith.constant dense<0.000000e+00> : vector<8x128xf32>
    %10 = tpu.matmul %8, %9, %cst_10 {dimension_numbers = #tpu.dot_dimension_numbers<[1], [0], [0], [1], [0, 0, 1, 1], [], []>} : vector<8x512xf32>, vector<512x128xf32>, vector<8x128xf32> -> vector<8x128xf32>
    %c0_11 = arith.constant 0 : index
    %c0_12 = arith.constant 0 : index
    %11 = vector.load %arg5[%c0_11, %c0_12] : memref<1x128xf32, #tpu.memory_space<vmem>>, vector<1x128xf32>
    %12 = vector.broadcast %11 : vector<1x128xf32> to vector<8x128xf32>
    %13 = arith.addf %10, %12 : vector<8x128xf32>
    %c0_13 = arith.constant 0 : index
    %c0_14 = arith.constant 0 : index
    %14 = vector.load %arg6[%c0_13, %c0_14] : memref<8x128xf32, #tpu.memory_space<vmem>>, vector<8x128xf32>
    tpu.vector_store %arg6[%c0_13, %c0_14], %13 {strides = array<i32>} : memref<8x128xf32, #tpu.memory_space<vmem>>, vector<8x128xf32>,
    return
  }
  func.func @transform_0(%arg0: i32) -> (i32, i32, i32) {
    %c0_i32 = arith.constant 0 : i32
    %c0_i32_0 = arith.constant 0 : i32
    %c0_i32_1 = arith.constant 0 : i32
    return %arg0, %c0_i32, %c0_i32_0 : i32, i32, i32
  }
  func.func @transform_1(%arg0: i32) -> (i32, i32) {
    %c0_i32 = arith.constant 0 : i32
    %c0_i32_0 = arith.constant 0 : i32
    %c0_i32_1 = arith.constant 0 : i32
    return %c0_i32, %c0_i32_0 : i32, i32
  }
  func.func @transform_2(%arg0: i32) -> (i32, i32) {
    %c0_i32 = arith.constant 0 : i32
    %c0_i32_0 = arith.constant 0 : i32
    %c0_i32_1 = arith.constant 0 : i32
    return %c0_i32, %c0_i32_0 : i32, i32
  }
  func.func @transform_3(%arg0: i32) -> (i32, i32) {
    %c0_i32 = arith.constant 0 : i32
    %c0_i32_0 = arith.constant 0 : i32
    %c0_i32_1 = arith.constant 0 : i32
    return %c0_i32, %c0_i32_0 : i32, i32
  }
  func.func @transform_4(%arg0: i32) -> (i32, i32) {
    %c0_i32 = arith.constant 0 : i32
    %c0_i32_0 = arith.constant 0 : i32
    %c0_i32_1 = arith.constant 0 : i32
    return %c0_i32, %c0_i32_0 : i32, i32
  }
  func.func @transform_5(%arg0: i32) -> (i32, i32) {
    %c0_i32 = arith.constant 0 : i32
    %c0_i32_0 = arith.constant 0 : i32
    return %arg0, %c0_i32 : i32, i32
  }
}

</mosaic_0001>

<bundles_post_ra>
// kernel: net_forward.1
= control target key start
LH: loop header
LB: loop body
LE: loop exit
PB: predicated region body
PF: predicated region fallthrough
CT: control target
= control target key end

     0   :  { %vm52_vm0 = vcmask 1043456   ;;  %v702_v44 = vmov 0.0   ;;  %v97_v51 = vlaneseq  ;;  %vm159_vm1 = vcmask 1041409   ;;  %s993_s0 = inlined_call_operand.vmem [shape: f32[8,4,256], index: 0, kind: input, shape index: {}]   ;;  %s994_s1 = inlined_call_operand.vmem [shape: f32[4,512], index: 1, kind: input, shape index: {}]   ;;  %s995_s3 = inlined_call_operand.vmem [shape: f32[512,128], index: 3, kind: input, shape index: {}]   ;;  %s996_s2 = inlined_call_operand.vmem [shape: f32[1,512], index: 2, kind: input, shape index: {}]   ;;  %s997_s4 = inlined_call_operand.vmem [shape: f32[1,128], index: 4, kind: input, shape index: {}]   ;;  %s998_s5 = inlined_call_operand.vmem [shape: f32[8,128], index: 5, kind: output, shape index: {}]  }
   0x1   :  { %v20_v0 = vld [vmem:[%s993_s0] sm:$0xff]  ;;  %v22_v1 = vld [vmem:[%s993_s0 + $0x10] sm:$0xff]  ;;  %v21_v2 = vld [vmem:[%s993_s0 + $0x8] sm:$0xff]  ;;  %252 = vmatprep.mubr.f32.mxu0 %v702_v44  ;;  %323 = vmatprep.mubr.f32.mxu1 %v702_v44  ;;  %vm161_vm2 = vcmask 1042434   ;;  %vm163_vm3 = vcmask 1043459   ;;  %vm165_vm4 = vcmask 1044484  }
   0x2   :  { %v36_v3 = vcombine.high %v20_v0, %v20_v0  ;;  %v53_v4 = vsel %vm52_vm0, %v20_v0, 0.0  ;;  %v38_v5 = vcombine.high %v22_v1, %v22_v1  ;;  %v63_v6 = vsel %vm52_vm0, %v22_v1, 0.0  ;;  %v23_v7 = vld [vmem:[%s993_s0 + $0x18] sm:$0xff]  ;;  %v24_v8 = vld [vmem:[%s993_s0 + $0x20] sm:$0xff]  ;;  %v25_v12 = vld [vmem:[%s993_s0 + $0x28] sm:$0xff] }
   0x3   :  { %v37_v9 = vcombine.high %v21_v2, %v21_v2  ;;  %v58_v10 = vsel %vm52_vm0, %v21_v2, 0.0  ;;  %v39_v11 = vcombine.high %v23_v7, %v23_v7  ;;  %v68_v15 = vsel %vm52_vm0, %v23_v7, 0.0  ;;  %v26_v21 = vld [vmem:[%s993_s0 + $0x30] sm:$0xff]  ;;  %v27_v22 = vld [vmem:[%s993_s0 + $0x38] sm:$0xff]  ;;  %v93_v40 = vld [vmem:[%s994_s1] sm:$0xff] }
   0x4   :  { %v54_v13 = vsel %vm52_vm0, %v36_v3, 0.0  ;;  %v64_v14 = vsel %vm52_vm0, %v38_v5, 0.0  ;;  %v40_v16 = vcombine.high %v24_v8, %v24_v8  ;;  %v41_v23 = vcombine.high %v25_v12, %v25_v12  ;;  %v94_v41 = vld [vmem:[%s994_s1 + $0x8] sm:$0xff]  ;;  %v350_v45 = vld [vmem:[%s995_s3 + $0x80] sm:$0xff]  ;;  %v388_v44 = vld [vmem:[%s995_s3 + $0x1b0] sm:$0xff] }
   0x5   :  { %v55_v17 = vadd.f32 %v54_v13, %v53_v4  ;;  %v65_v18 = vadd.f32 %v64_v14, %v63_v6  ;;  %v59_v19 = vsel %vm52_vm0, %v37_v9, 0.0  ;;  %v69_v20 = vsel %vm52_vm0, %v39_v11, 0.0  ;;  %v351_v46 = vld [vmem:[%s995_s3 + $0x88] sm:$0xff]  ;;  %v382_v47 = vld [vmem:[%s995_s3 + $0x180] sm:$0xff]  ;;  %v352_v11 = vld [vmem:[%s995_s3 + $0x90] sm:$0xff] }
   0x6   :  { %v60_v24 = vadd.f32 %v59_v19, %v58_v10  ;;  %v70_v25 = vadd.f32 %v69_v20, %v68_v15  ;;  %v73_v26 = vsel %vm52_vm0, %v24_v8, 0.0  ;;  %v74_v27 = vsel %vm52_vm0, %v40_v16, 0.0  ;;  %v383_v49 = vld [vmem:[%s995_s3 + $0x188] sm:$0xff]  ;;  %v334_v6 = vld [vmem:[%s995_s3] sm:$0xff]  ;;  %v353_v14 = vld [vmem:[%s995_s3 + $0x98] sm:$0xff] }
   0x7   :  { %56 = vadd.xlane.f32.xlu0 %v55_v17  ;;  %66 = vadd.xlane.f32.xlu1 %v65_v18  ;;  %v78_v28 = vsel %vm52_vm0, %v25_v12, 0.0  ;;  %v79_v29 = vsel %vm52_vm0, %v41_v23, 0.0  ;;  %v42_v30 = vcombine.high %v26_v21, %v26_v21  ;;  %v43_v31 = vcombine.high %v27_v22, %v27_v22  ;;  %v335_v7 = vld [vmem:[%s995_s3 + $0x8] sm:$0xff]  ;;  %v366_v9 = vld [vmem:[%s995_s3 + $0x100] sm:$0xff]  ;;  %v384_v15 = vld [vmem:[%s995_s3 + $0x190] sm:$0xff] }
   0x8   :  { %v75_v32 = vadd.f32 %v74_v27, %v73_v26  ;;  %v80_v33 = vadd.f32 %v79_v29, %v78_v28  ;;  %v83_v34 = vsel %vm52_vm0, %v26_v21, 0.0  ;;  %v88_v36 = vsel %vm52_vm0, %v27_v22, 0.0  ;;  %v367_v10 = vld [vmem:[%s995_s3 + $0x108] sm:$0xff]  ;;  %v385_v16 = vld [vmem:[%s995_s3 + $0x198] sm:$0xff]  ;;  %v336_v22 = vld [vmem:[%s995_s3 + $0x10] sm:$0xff] }
   0x9   :  { %v84_v35 = vsel %vm52_vm0, %v42_v30, 0.0  ;;  %v89_v37 = vsel %vm52_vm0, %v43_v31, 0.0  ;;  %v175_v42 = vcombine.high %v93_v40, %v93_v40  ;;  %v176_v43 = vcombine.high %v94_v41, %v94_v41  ;;  %v337_v23 = vld [vmem:[%s995_s3 + $0x18] sm:$0xff]  ;;  %v368_v27 = vld [vmem:[%s995_s3 + $0x110] sm:$0xff]  ;;  %v354_v29 = vld [vmem:[%s995_s3 + $0xa0] sm:$0xff] }
   0xa   :  { %v85_v38 = vadd.f32 %v84_v35, %v83_v34  ;;  %v90_v39 = vadd.f32 %v89_v37, %v88_v36  ;;  %v627_v48 = vpack.c.bf16 %v351_v46, %v350_v45  ;;  %v659_v50 = vpack.c.bf16 %v383_v49, %v382_v47  ;;  %v369_v28 = vld [vmem:[%s995_s3 + $0x118] sm:$0xff]  ;;  %v355_v31 = vld [vmem:[%s995_s3 + $0xa8] sm:$0xff]  ;;  %v338_v36 = vld [vmem:[%s995_s3 + $0x20] sm:$0xff] }
   0xb   :  { %61 = vadd.xlane.f32.xlu0 %v60_v24  ;;  %71 = vadd.xlane.f32.xlu1 %v70_v25  ;;  %v795_v52 = vshrl.u32 %v97_v51, 7  ;;  %v126_v53 = vand.u32 127, %v97_v51  ;;  %vm167_vm5 = vcmask 1045509   ;;  %vm169_vm6 = vcmask 1046534   ;;  %v339_v37 = vld [vmem:[%s995_s3 + $0x28] sm:$0xff]  ;;  %v389_v45 = vld [vmem:[%s995_s3 + $0x1b8] sm:$0xff] }
   0xc   :  { %550 = vmatprep.subr.msk.mxu0 %vm52_vm0, %v175_v42  ;;  %553 = vmatprep.subr.msk.mxu1 %vm52_vm0, %v176_v43  ;;  %vm171_vm7 = vcmask 1047559   ;;  %vm177_vm8 = vcmask 31744   ;;  %v629_v20 = vpack.c.bf16 %v335_v7, %v334_v6  ;;  %v661_v21 = vpack.c.bf16 %v367_v10, %v366_v9  ;;  %v356_v42 = vld [vmem:[%s995_s3 + $0xb0] sm:$0xff]  ;;  %v357_v43 = vld [vmem:[%s995_s3 + $0xb8] sm:$0xff] }
   0xd   :  { %551 = vmatpush1.msk.msra.mxu0 %vm52_vm0, %v93_v40  ;;  %554 = vmatpush1.msk.msra.mxu1 %vm52_vm0, %v94_v41  ;;  %v129_v56 = vsub.s32 %v126_v53, %v795_v52  ;;  %v631_v25 = vpack.c.bf16 %v353_v14, %v352_v11  ;;  %v663_v26 = vpack.c.bf16 %v385_v16, %v384_v15  ;;  %v370_v40 = vld [vmem:[%s995_s3 + $0x120] sm:$0xff]  ;;  %v371_v41 = vld [vmem:[%s995_s3 + $0x128] sm:$0xff]  ;;  %v341_v49 = vld [vmem:[%s995_s3 + $0x38] sm:$0xff] }
   0xe   :  { %628 = vmatprep.subr.bf16.mxu0 %v627_v48  ;;  %660 = vmatprep.subr.bf16.mxu1 %v659_v50  ;;  %v633_v34 = vpack.c.bf16 %v337_v23, %v336_v22  ;;  %v665_v35 = vpack.c.bf16 %v369_v28, %v368_v27  ;;  %v637_v46 = vpack.c.bf16 %v339_v37, %v338_v36  ;;  %v340_v48 = vld [vmem:[%s995_s3 + $0x30] sm:$0xff]  ;;  %v393_v6 = vld [vmem:[%s995_s3 + $0x1d8] sm:$0xff]  ;;  %v362_v15 = vld [vmem:[%s995_s3 + $0xe0] sm:$0xff] }
   0xf   :  { %76 = vadd.xlane.f32.xlu0 %v75_v32  ;;  %81 = vadd.xlane.f32.xlu1 %v80_v33  ;;  %v386_v32 = vld [vmem:[%s995_s3 + $0x1a0] sm:$0xff]  ;;  %v387_v33 = vld [vmem:[%s995_s3 + $0x1a8] sm:$0xff]  ;;  %v669_v47 = vpack.c.bf16 %v371_v41, %v370_v40  ;;  %v639_v50 = vpack.c.bf16 %v357_v43, %v356_v42  ;;  %v671_v51 = vpack.c.bf16 %v389_v45, %v388_v44  ;;  %v372_v53 = vld [vmem:[%s995_s3 + $0x130] sm:$0xff]  ;;  %v99_v41 = vsub.s32 0, %v795_v52 }
  0x10   :  { %v344_v9 = vld [vmem:[%s995_s3 + $0x50] sm:$0xff]  ;;  %v345_v10 = vld [vmem:[%s995_s3 + $0x58] sm:$0xff]  ;;  %v363_v16 = vld [vmem:[%s995_s3 + $0xe8] sm:$0xff]  ;;  %v107_v42 = vsub.s32 2, %v795_v52  ;;  %v103_v44 = vsub.s32 1, %v795_v52  ;;  %v111_v45 = vsub.s32 3, %v795_v52 }
  0x11   :  { %v377_v14 = vld [vmem:[%s995_s3 + $0x158] sm:$0xff]  ;;  %v346_v23 = vld [vmem:[%s995_s3 + $0x60] sm:$0xff]  ;;  %v379_v27 = vld [vmem:[%s995_s3 + $0x168] sm:$0xff] }
  0x12   :  { %v95_v43 = vld [vmem:[%s996_s2] sm:$0xf] }
  0x13   :  { %86 = vadd.xlane.f32.xlu0 %v85_v38  ;;  %91 = vadd.xlane.f32.xlu1 %v90_v39  ;;  %v635_v38 = vpack.c.bf16 %v355_v31, %v354_v29  ;;  %v667_v39 = vpack.c.bf16 %v387_v33, %v386_v32  ;;  %v364_v29 = vld [vmem:[%s995_s3 + $0xf0] sm:$0xff]  ;;  %v397_v33 = vld [vmem:[%s995_s3 + $0x1f8] sm:$0xff] }
  0x14   :  { %v396_v31 = vld [vmem:[%s995_s3 + $0x1f0] sm:$0xff] }
  0x15   :  { %v687_v36 = vpack.c.bf16 %v397_v33, %v396_v31 }
  0x94   :  { %v57_v54 = vpop.xlane.xlu0 %56  ;;  %v67_v55 = vpop.xlane.xlu1 %66 }
  0x95   :  { %v130_v59 = vrot.slane %v57_v54, %v129_v56  ;;  %v138_v62 = vrot.slane %v67_v55, %v129_v56  ;;  %v373_v54 = vld [vmem:[%s995_s3 + $0x138] sm:$0xff]  ;;  %v358_v55 = vld [vmem:[%s995_s3 + $0xc0] sm:$0xff] }
  0x98   :  { %v62_v57 = vpop.xlane.xlu0 %61  ;;  %v72_v58 = vpop.xlane.xlu1 %71 }
  0x99   :  { %v134_v60 = vrot.slane %v62_v57, %v129_v56  ;;  %v142_v61 = vrot.slane %v72_v58, %v129_v56  ;;  %v390_v57 = vld [vmem:[%s995_s3 + $0x1c0] sm:$0xff]  ;;  %v391_v58 = vld [vmem:[%s995_s3 + $0x1c8] sm:$0xff] }
  0x9b   :  { %v160_v63 = vsel %vm159_vm1, %v134_v60, %v130_v59  ;;  %v641_v59 = vpack.c.bf16 %v341_v49, %v340_v48  ;;  %v673_v60 = vpack.c.bf16 %v373_v54, %v372_v53  ;;  %v104_v48 = vrot.slane %v95_v43, %v103_v44 }
  0x9c   :  { %v162_v0 = vsel %vm161_vm2, %v138_v62, %v160_v63  ;;  %v77_v1 = vpop.xlane.xlu0 %76  ;;  %v82_v2 = vpop.xlane.xlu1 %81  ;;  %v343_v62 = vld [vmem:[%s995_s3 + $0x48] sm:$0xff]  ;;  %v112_v49 = vrot.slane %v95_v43, %v111_v45 }
  0x9d   :  { %v164_v3 = vsel %vm163_vm3, %v142_v61, %v162_v0  ;;  %v146_v4 = vrot.slane %v77_v1, %v129_v56  ;;  %v150_v5 = vrot.slane %v82_v2, %v129_v56  ;;  %v342_v61 = vld [vmem:[%s995_s3 + $0x40] sm:$0xff]  ;;  %v675_v0 = vpack.c.bf16 %v391_v58, %v390_v57  ;;  %v375_v2 = vld [vmem:[%s995_s3 + $0x148] sm:$0xff] }
  0x9e   :  { %v374_v1 = vld [vmem:[%s995_s3 + $0x140] sm:$0xff]  ;;  %v645_v7 = vpack.c.bf16 %v343_v62, %v342_v61 }
  0x9f   :  { %v166_v8 = vsel %vm165_vm4, %v146_v4, %v164_v3  ;;  %v360_v3 = vld [vmem:[%s995_s3 + $0xd0] sm:$0xff]  ;;  %v361_v4 = vld [vmem:[%s995_s3 + $0xd8] sm:$0xff] }
  0xa0   :  { %v87_v12 = vpop.xlane.xlu0 %86  ;;  %v92_v13 = vpop.xlane.xlu1 %91  ;;  %v168_v19 = vsel %vm167_vm5, %v150_v5, %v166_v8  ;;  %v392_v5 = vld [vmem:[%s995_s3 + $0x1d0] sm:$0xff]  ;;  %v677_v8 = vpack.c.bf16 %v375_v2, %v374_v1  ;;  %v647_v11 = vpack.c.bf16 %v361_v4, %v360_v3 }
  0xa1   :  { %v154_v17 = vrot.slane %v87_v12, %v129_v56  ;;  %v158_v18 = vrot.slane %v92_v13, %v129_v56  ;;  %v359_v56 = vld [vmem:[%s995_s3 + $0xc8] sm:$0xff]  ;;  %v679_v12 = vpack.c.bf16 %v393_v6, %v392_v5  ;;  %v376_v13 = vld [vmem:[%s995_s3 + $0x150] sm:$0xff] }
  0xa2   :  { %v643_v63 = vpack.c.bf16 %v359_v56, %v358_v55 }
  0xa3   :  { %v170_v24 = vsel %vm169_vm6, %v154_v17, %v168_v19  ;;  %v394_v17 = vld [vmem:[%s995_s3 + $0x1e0] sm:$0xff]  ;;  %v649_v19 = vpack.c.bf16 %v345_v10, %v344_v9 }
  0xa4   :  { %v172_v30 = vsel %vm171_vm7, %v158_v18, %v170_v24  ;;  %v395_v18 = vld [vmem:[%s995_s3 + $0x1e8] sm:$0xff] }
  0xa5   :  { %552 = vmatmul.mubr.msk.f32.vlgmr.msra.gmra.mrb[0].mxu0 %vm177_vm8, %v172_v30  ;;  %555 = vmatmul.mubr.msk.f32.vlgmr.msra.gmra.mrb[0].mxu1 %vm177_vm8, %v172_v30  ;;  %v683_v22 = vpack.c.bf16 %v395_v18, %v394_v17  ;;  %v347_v24 = vld [vmem:[%s995_s3 + $0x68] sm:$0xff]  ;;  %v365_v30 = vld [vmem:[%s995_s3 + $0xf8] sm:$0xff] }
  0xa6   :  { %630 = vmatpush3.bf16.msra.mxu0 %v629_v20  ;;  %662 = vmatpush3.bf16.msra.mxu1 %v661_v21  ;;  %v681_v20 = vpack.c.bf16 %v377_v14, %v376_v13  ;;  %v651_v21 = vpack.c.bf16 %v363_v16, %v362_v15  ;;  %v655_v32 = vpack.c.bf16 %v365_v30, %v364_v29 }
  0xa7   :  { %632 = vmatprep.subr.bf16.mxu0 %v631_v25  ;;  %664 = vmatprep.subr.bf16.mxu1 %v663_v26  ;;  %v378_v25 = vld [vmem:[%s995_s3 + $0x160] sm:$0xff]  ;;  %v653_v26 = vpack.c.bf16 %v347_v24, %v346_v23 }
  0xa8   :  { %v685_v28 = vpack.c.bf16 %v379_v27, %v378_v25 }
  0xaa   :  { %634 = vmatpush3.bf16.msra.mxu0 %v633_v34  ;;  %666 = vmatpush3.bf16.msra.mxu1 %v665_v35  ;;  %v348_v34 = vld [vmem:[%s995_s3 + $0x70] sm:$0xff]  ;;  %v349_v35 = vld [vmem:[%s995_s3 + $0x78] sm:$0xff] }
  0xab   :  { %636 = vmatprep.subr.bf16.mxu0 %v635_v38  ;;  %668 = vmatprep.subr.bf16.mxu1 %v667_v39  ;;  %v657_v37 = vpack.c.bf16 %v349_v35, %v348_v34  ;;  %v380_v38 = vld [vmem:[%s995_s3 + $0x170] sm:$0xff]  ;;  %v381_v39 = vld [vmem:[%s995_s3 + $0x178] sm:$0xff] }
  0xac   :  { %v689_v40 = vpack.c.bf16 %v381_v39, %v380_v38 }
  0xae   :  { %638 = vmatpush3.bf16.msra.mxu0 %v637_v46  ;;  %670 = vmatpush3.bf16.msra.mxu1 %v669_v47  ;;  %v100_v46 = vrot.slane %v95_v43, %v99_v41  ;;  %v108_v47 = vrot.slane %v95_v43, %v107_v42 }
  0xaf   :  { %640 = vmatprep.subr.bf16.mxu0 %v639_v50  ;;  %672 = vmatprep.subr.bf16.mxu1 %v671_v51 }
  0xb2   :  { %642 = vmatpush3.bf16.msra.mxu0 %v641_v59  ;;  %674 = vmatpush3.bf16.msra.mxu1 %v673_v60 }
  0xb3   :  { %644 = vmatprep.subr.bf16.mxu0 %v643_v63  ;;  %676 = vmatprep.subr.bf16.mxu1 %v675_v0  ;;  %v556_v0 = vld [vmem:[%s997_s4] ss:$0 sm:$0xff] }
  0xb6   :  { %646 = vmatpush3.bf16.msra.mxu0 %v645_v7  ;;  %678 = vmatpush3.bf16.msra.mxu1 %v677_v8 }
  0xb7   :  { %648 = vmatprep.subr.bf16.mxu0 %v647_v11  ;;  %680 = vmatprep.subr.bf16.mxu1 %v679_v12 }
  0xba   :  { %650 = vmatpush3.bf16.msra.mxu0 %v649_v19  ;;  %682 = vmatpush3.bf16.msra.mxu1 %v681_v20 }
  0xbb   :  { %652 = vmatprep.subr.bf16.mxu0 %v651_v21  ;;  %684 = vmatprep.subr.bf16.mxu1 %v683_v22 }
  0xbe   :  { %654 = vmatpush3.bf16.msra.mxu0 %v653_v26  ;;  %686 = vmatpush3.bf16.msra.mxu1 %v685_v28 }
  0xbf   :  { %656 = vmatprep.subr.bf16.mxu0 %v655_v32  ;;  %688 = vmatprep.subr.bf16.mxu1 %v687_v36 }
  0xc2   :  { %658 = vmatpush3.bf16.msra.mxu0 %v657_v37  ;;  %690 = vmatpush3.bf16.msra.mxu1 %v689_v40 }
 0x178   :  { %v254_v50 = vpop.f32.mrb[0].mxu0  ;;  %v325_v51 = vpop.f32.mrb[0].mxu1 }
 0x179   :  { %v255_v53 = vadd.f32 %v254_v50, %v100_v46  ;;  %v326_v54 = vadd.f32 %v325_v51, %v108_v47  ;;  %v256_v55 = vpop.f32.mrb[1].mxu0  ;;  %v327_v56 = vpop.f32.mrb[1].mxu1 }
 0x17a   :  { %v257_v57 = vadd.f32 %v256_v55, %v104_v48  ;;  %v328_v58 = vadd.f32 %v327_v56, %v112_v49 }
 0x17b   :  { %v330_v61 = vmax.f32 %v255_v53, 0.0  ;;  %v332_v62 = vmax.f32 %v326_v54, 0.0 }
 0x17c   :  { %v331_v59 = vmax.f32 %v257_v57, 0.0  ;;  %v333_v60 = vmax.f32 %v328_v58, 0.0 }
 0x17e   :  { %469 = vmatprep.mubr.f32.mxu0 %v331_v59  ;;  %539 = vmatprep.mubr.f32.mxu1 %v333_v60 }
 0x17f   :  { %470 = vmatmul.mubr.f32.vlgmr.msra.gmra.mrb[2].mxu0 %v330_v61  ;;  %540 = vmatmul.mubr.f32.vlgmr.msra.gmra.mrb[2].mxu1 %v332_v62 }
 0x252   :  { %v589_v52 = vpop.f32.mrb[2].mxu0  ;;  %v624_v63 = vpop.f32.mrb[2].mxu1 }
 0x253   :  { %v590_v1 = vpop.f32.mrb[3].mxu0  ;;  %v625_v2 = vpop.f32.mrb[3].mxu1 }
 0x254   :  { %v591_v3 = vadd.f32 %v590_v1, %v589_v52  ;;  %v626_v4 = vadd.f32 %v625_v2, %v624_v63 }
 0x256   :  { %v472_v5 = vadd.f32 %v591_v3, %v556_v0 }
 0x258   :  { %v542_v6 = vadd.f32 %v626_v4, %v472_v5 }
 0x25a   :  { %545 = vst [vmem:[%s998_s5] sm:$0xff] %v542_v6 }

</bundles_post_ra>
